<compile_context>
chip_gen: v7x
topology: tpu7x:2x2x1
jax: 0.10.0
libtpu: 0.0.40
codegen_flags: <defaults>
</compile_context>

<pallas_src>
import functools

import jax
import jax.numpy as jnp
from jax.experimental import pallas as pl
from jax.experimental.pallas import tpu as pltpu

EPS = 1e-5


# ------------------------------- small helpers -------------------------------

def _round_up(x, m):
    return ((x + m - 1) // m) * m


def _pad2d(x, rows, cols):
    r, c = x.shape
    if r == rows and c == cols:
        return x
    return jnp.pad(x, ((0, rows - r), (0, cols - c)))


def _pad1d(v, n):
    if v.shape[0] == n:
        return v
    return jnp.pad(v, (0, n - v.shape[0]))


def _pick_tm(m, cap=512):
    """M tile: multiple of 16 (bf16 sublane packing), <= cap, minimizing padding."""
    if m <= cap:
        return _round_up(m, 16)
    best, best_pad = cap, _round_up(m, cap) - m
    for tm in range(cap, 255, -16):
        pad = _round_up(m, tm) - m
        if pad < best_pad:
            best, best_pad = tm, pad
    return best


def _pick_elem_tile(mp):
    """Tile for elementwise passes: divides mp (a multiple of 16), <= 1024."""
    if mp <= 1024:
        return mp
    for t in range(1024, 15, -16):
        if mp % t == 0:
            return t
    return mp


# ----------------------------- Pallas kernels -------------------------------

def _conv_matmul_stats_kernel(a_ref, b_ref, o_ref, stats_ref, acc_ref):
    # Tiled MXU matmul with f32 accumulator; K is the innermost ("arbitrary")
    # axis.  At the last K step, also emit per-channel partial sum / sum-of-
    # squares of the accumulator (BN statistics), avoiding a second HBM pass.
    @pl.when(pl.program_id(2) == 0)
    def _():
        acc_ref[...] = jnp.zeros_like(acc_ref)

    acc_ref[...] += jnp.dot(a_ref[...], b_ref[...],
                            preferred_element_type=jnp.float32)

    @pl.when(pl.program_id(2) == pl.num_programs(2) - 1)
    def _():
        acc = acc_ref[...]
        o_ref[...] = acc.astype(o_ref.dtype)            # bf16 conv output
        colsum = jnp.sum(acc, axis=0, keepdims=True)     # (1, tn)
        colsq = jnp.sum(acc * acc, axis=0, keepdims=True)
        row = jax.lax.broadcasted_iota(jnp.int32, stats_ref.shape, 0)
        stats_ref[...] = jnp.where(row == 0, colsum,
                                   jnp.where(row == 1, colsq, 0.0))


def _scale_shift_relu_kernel(x_ref, s_ref, t_ref, o_ref):
    # y = relu(x * scale + shift); scale/shift are precomputed [1, C] rows.
    y = x_ref[...].astype(jnp.float32) * s_ref[...] + t_ref[...]
    o_ref[...] = jnp.maximum(y, 0.0).astype(o_ref.dtype)


def _bn_add_relu_kernel(x_ref, sx_ref, tx_ref, r_ref, sr_ref, tr_ref, o_ref):
    # y = relu(bn2(x) + bn_sc(residual)) fused into a single elementwise pass.
    y = x_ref[...].astype(jnp.float32) * sx_ref[...] + tx_ref[...]
    z = r_ref[...].astype(jnp.float32) * sr_ref[...] + tr_ref[...]
    o_ref[...] = jnp.maximum(y + z, 0.0).astype(o_ref.dtype)


# ----------------------------- Pallas wrappers -------------------------------

def pallas_conv_matmul(a, b):
    """[M, K] @ [K, N] (bf16 in, f32 acc) -> (bf16 [M_pad, N_pad],
    f32 partial stats [num_i*8, N_pad] with row 0 = col-sum, row 1 = col-sumsq
    per M tile).  Inputs zero-padded to lane-dense multiples."""
    M, K = a.shape
    K2, N = b.shape
    assert K == K2
    tm = _pick_tm(M)
    tk = min(256, _round_up(K, 128))
    tn = min(512, _round_up(N, 128))
    M_pad = _round_up(M, tm)
    K_pad = _round_up(K, tk)
    N_pad = _round_up(N, tn)

    a_p = _pad2d(a, M_pad, K_pad).astype(jnp.bfloat16)
    b_p = _pad2d(b, K_pad, N_pad).astype(jnp.bfloat16)

    n_i = M_pad // tm
    out, stats = pl.pallas_call(
        _conv_matmul_stats_kernel,
        out_shape=(jax.ShapeDtypeStruct((M_pad, N_pad), jnp.bfloat16),
                   jax.ShapeDtypeStruct((n_i * 8, N_pad), jnp.float32)),
        grid=(n_i, N_pad // tn, K_pad // tk),
        in_specs=[pl.BlockSpec((tm, tk), lambda i, j, k: (i, k)),
                  pl.BlockSpec((tk, tn), lambda i, j, k: (k, j))],
        out_specs=(pl.BlockSpec((tm, tn), lambda i, j, k: (i, j)),
                   pl.BlockSpec((8, tn), lambda i, j, k: (i, j))),
        scratch_shapes=[pltpu.VMEM((tm, tn), jnp.float32)],
        compiler_params=pltpu.CompilerParams(
            dimension_semantics=("parallel", "parallel", "arbitrary")),
    )(a_p, b_p)
    return out, stats


def _bn_from_stats(stats, m_real, gamma_pad, beta_pad):
    """Reduce per-tile partial sums (tiny [num_i, Cp] work, plain JAX) and
    compute the per-channel affine ONCE.  Padded rows/channels contribute 0."""
    cp = stats.shape[-1]
    s = stats.reshape(-1, 8, cp)
    total = jnp.sum(s[:, 0, :], axis=0)
    totsq = jnp.sum(s[:, 1, :], axis=0)
    mean = total / m_real
    var = jnp.maximum(totsq / m_real - mean * mean, 0.0)
    inv = jax.lax.rsqrt(var + EPS)
    scale = gamma_pad * inv
    shift = beta_pad - mean * scale
    return scale.reshape(1, -1), shift.reshape(1, -1)


def pallas_scale_shift_relu(x_pad, scale, shift, out_dtype=jnp.bfloat16):
    Mp, Cp = x_pad.shape
    tm = _pick_elem_tile(Mp)
    return pl.pallas_call(
        _scale_shift_relu_kernel,
        out_shape=jax.ShapeDtypeStruct((Mp, Cp), out_dtype),
        grid=(Mp // tm,),
        in_specs=[pl.BlockSpec((tm, Cp), lambda i: (i, 0)),
                  pl.BlockSpec((1, Cp), lambda i: (0, 0)),
                  pl.BlockSpec((1, Cp), lambda i: (0, 0))],
        out_specs=pl.BlockSpec((tm, Cp), lambda i: (i, 0)),
        compiler_params=pltpu.CompilerParams(
            dimension_semantics=("parallel",)),
    )(x_pad, scale, shift)


def pallas_bn_add_relu(x_pad, sx, tx, r_pad, sr, tr, out_dtype=jnp.float32):
    # Final output kept f32 to match the PyTorch module; switch to bf16 if the
    # consumer is another bf16 block.
    Mp, Cp = x_pad.shape
    tm = _pick_elem_tile(Mp)
    return pl.pallas_call(
        _bn_add_relu_kernel,
        out_shape=jax.ShapeDtypeStruct((Mp, Cp), out_dtype),
        grid=(Mp // tm,),
        in_specs=[pl.BlockSpec((tm, Cp), lambda i: (i, 0)),
                  pl.BlockSpec((1, Cp), lambda i: (0, 0)),
                  pl.BlockSpec((1, Cp), lambda i: (0, 0)),
                  pl.BlockSpec((tm, Cp), lambda i: (i, 0)),
                  pl.BlockSpec((1, Cp), lambda i: (0, 0)),
                  pl.BlockSpec((1, Cp), lambda i: (0, 0))],
        out_specs=pl.BlockSpec((tm, Cp), lambda i: (i, 0)),
        compiler_params=pltpu.CompilerParams(
            dimension_semantics=("parallel",)),
    )(x_pad, sx, tx, r_pad, sr, tr)


# --------------------------- conv glue (im2col) ------------------------------

def _im2col(x_nhwc, ksize, stride, padding):
    """x_nhwc: [N, H, W, C] -> ([N*Hout*Wout, ksize*ksize*C], Hout, Wout)."""
    N, H, W, C = x_nhwc.shape
    Hp, Wp = H + 2 * padding, W + 2 * padding
    Hout = (Hp - ksize) // stride + 1
    Wout = (Wp - ksize) // stride + 1
    xp = jnp.pad(x_nhwc, ((0, 0), (padding, padding), (padding, padding), (0, 0)))
    cols = []
    for ky in range(ksize):
        for kx in range(ksize):
            patch = xp[:, ky:ky + (Hout - 1) * stride + 1:stride,
                       kx:kx + (Wout - 1) * stride + 1:stride, :]
            cols.append(patch)
    patches = jnp.concatenate(cols, axis=-1)            # [N, Hout, Wout, k*k*C]
    return patches.reshape(N * Hout * Wout, ksize * ksize * C), Hout, Wout


def _weight_to_matmul(w_oihw):
    """PyTorch [C_out, C_in, kH, kW] -> bf16 [kH*kW*C_in, C_out] (im2col order)."""
    C_out, C_in, kH, kW = w_oihw.shape
    return jnp.transpose(w_oihw, (2, 3, 1, 0)).reshape(kH * kW * C_in, C_out) \
              .astype(jnp.bfloat16)


# ------------------------------ BasicBlock -----------------------------------

def init_basic_block_params(key, in_planes, planes, stride):
    k1, k2, k3 = jax.random.split(key, 3)
    params = {
        "conv1_w": 0.1 * jax.random.normal(k1, (planes, in_planes, 3, 3), jnp.float32),
        "bn1_gamma": jnp.ones((planes,), jnp.float32),
        "bn1_beta": jnp.zeros((planes,), jnp.float32),
        "conv2_w": 0.1 * jax.random.normal(k2, (planes, planes, 3, 3), jnp.float32),
        "bn2_gamma": jnp.ones((planes,), jnp.float32),
        "bn2_beta": jnp.zeros((planes,), jnp.float32),
    }
    if stride != 1 or in_planes != planes:
        params["sc_conv_w"] = 0.1 * jax.random.normal(k3, (planes, in_planes, 1, 1), jnp.float32)
        params["sc_bn_gamma"] = jnp.ones((planes,), jnp.float32)
        params["sc_bn_beta"] = jnp.zeros((planes,), jnp.float32)
    return params


@functools.partial(jax.jit, static_argnames=("stride",))
def basic_block_forward(params, x_nchw, stride):
    # PyTorch NCHW -> NHWC working layout, single bf16 cast reused everywhere.
    x_bf16 = jnp.transpose(x_nchw, (0, 2, 3, 1)).astype(jnp.bfloat16)
    N, H, W, C_in = x_bf16.shape
    planes = params["conv1_w"].shape[0]

    # ---- conv1 (3x3, stride, pad 1) with BN1 stats in the matmul epilogue ----
    p1, H1, W1 = _im2col(x_bf16, 3, stride, 1)
    o1, st1 = pallas_conv_matmul(p1, _weight_to_matmul(params["conv1_w"]))
    M1 = N * H1 * W1
    Cp1 = o1.shape[1]
    s1, t1 = _bn_from_stats(st1, M1,
                            _pad1d(params["bn1_gamma"], Cp1),
                            _pad1d(params["bn1_beta"], Cp1))
    # bf16 in / bf16 out: it feeds the bf16 conv2 im2col anyway.
    o1_act = pallas_scale_shift_relu(o1, s1, t1, out_dtype=jnp.bfloat16)

    # ---- conv2 (3x3, stride 1, pad 1) with BN2 stats in the epilogue ----
    o1_nhwc = o1_act[:M1, :planes].reshape(N, H1, W1, planes)
    p2, H2, W2 = _im2col(o1_nhwc, 3, 1, 1)
    o2, st2 = pallas_conv_matmul(p2, _weight_to_matmul(params["conv2_w"]))
    M2 = N * H2 * W2
    M2p, Cp2 = o2.shape
    s2, t2 = _bn_from_stats(st2, M2,
                            _pad1d(params["bn2_gamma"], Cp2),
                            _pad1d(params["bn2_beta"], Cp2))

    # ---- shortcut (1x1 conv + BN, or identity), carried in bf16 ----
    if "sc_conv_w" in params:
        psc, _, _ = _im2col(x_bf16, 1, stride, 0)
        r, st_sc = pallas_conv_matmul(psc, _weight_to_matmul(params["sc_conv_w"]))
        assert r.shape == o2.shape  # same M, same C_out -> same padding
        ssc, tsc = _bn_from_stats(st_sc, M2,
                                  _pad1d(params["sc_bn_gamma"], Cp2),
                                  _pad1d(params["sc_bn_beta"], Cp2))
    else:
        r = _pad2d(x_bf16.reshape(N * H * W, C_in), M2p, Cp2)
        ssc = jnp.ones((1, Cp2), jnp.float32)
        tsc = jnp.zeros((1, Cp2), jnp.float32)

    # ---- bn2 + shortcut BN + residual add + relu, fused in one pass ----
    out_pad = pallas_bn_add_relu(o2, s2, t2, r, ssc, tsc)
    out = out_pad[:M2, :planes].reshape(N, H2, W2, planes)
    return jnp.transpose(out, (0, 3, 1, 2))


# ------------------------- plain-JAX reference (check) ------------------------

def reference_forward(params, x_nchw, stride):
    def conv(x, w, s, pad):
        return jax.lax.conv_general_dilated(
            x, w, window_strides=(s, s), padding=((pad, pad), (pad, pad)),
            dimension_numbers=("NCHW", "OIHW", "NCHW"))

    def bn(x, g, b):
        mean = jnp.mean(x, axis=(0, 2, 3), keepdims=True)
        var = jnp.mean((x - mean) ** 2, axis=(0, 2, 3), keepdims=True)
        return ((x - mean) * jax.lax.rsqrt(var + EPS)
                * g.reshape(1, -1, 1, 1) + b.reshape(1, -1, 1, 1))

    out = jax.nn.relu(bn(conv(x_nchw, params["conv1_w"], stride, 1),
                         params["bn1_gamma"], params["bn1_beta"]))
    out = bn(conv(out, params["conv2_w"], 1, 1),
             params["bn2_gamma"], params["bn2_beta"])
    if "sc_conv_w" in params:
        sc = bn(conv(x_nchw, params["sc_conv_w"], stride, 0),
                params["sc_bn_gamma"], params["sc_bn_beta"])
    else:
        sc = x_nchw
    return jax.nn.relu(out + sc)


# ------------------------------------ main ------------------------------------

if __name__ == "__main__":
    key = jax.random.PRNGKey(0)
    kx1, kx2, kp1, kp2 = jax.random.split(key, 4)

    # Case 1: downsampling block (conv shortcut). batch=2, in=4, planes=8, 16x16, stride=2.
    N, C_in, H, W = 2, 4, 16, 16
    planes, stride = 8, 2
    x1 = jax.random.normal(kx1, (N, C_in, H, W), jnp.float32)
    params1 = init_basic_block_params(kp1, C_in, planes, stride)
    out1 = jax.block_until_ready(basic_block_forward(params1, x1, stride))
    ref1 = reference_forward(params1, x1, stride)
    assert out1.shape == (N, planes, H // stride, W // stride), out1.shape
    assert bool(jnp.all(out1 >= 0.0)) and bool(jnp.all(jnp.isfinite(out1)))
    assert float(jnp.max(jnp.abs(out1 - ref1))) < 1e-1

    # Case 2: identity shortcut. in_planes == planes, stride=1.
    x2 = jax.random.normal(kx2, (2, 8, 16, 16), jnp.float32)
    params2 = init_basic_block_params(kp2, 8, 8, 1)
    out2 = jax.block_until_ready(basic_block_forward(params2, x2, 1))
    ref2 = reference_forward(params2, x2, 1)
    assert out2.shape == (2, 8, 16, 16), out2.shape
    assert bool(jnp.all(out2 >= 0.0)) and bool(jnp.all(jnp.isfinite(out2)))
    assert float(jnp.max(jnp.abs(out2 - ref2))) < 1e-1

    print("KERNEL_OK")
</pallas_src>

<mosaic_0001>
module attributes {stable_mosaic.version = 11 : i64} {
  func.func @_scale_shift_relu_kernel(%arg0: i32, %arg1: memref<128x128xbf16, #tpu.memory_space<vmem>>, %arg2: memref<1x128xf32, #tpu.memory_space<vmem>>, %arg3: memref<1x128xf32, #tpu.memory_space<vmem>>, %arg4: memref<128x128xbf16, #tpu.memory_space<vmem>>) attributes {dimension_semantics = [#tpu.dimension_semantics<parallel>], iteration_bounds = array<i64: 1>, scalar_prefetch = 0 : i64, scratch_operands = 0 : i64, tpu.core_type = #tpu.core_type<tc>, window_params = [{transform_indices = @transform_0, window_bounds = array<i64: 128, 128>}, {pipeline_mode = #tpu.pipeline_mode<synchronous>, transform_indices = @transform_1, window_bounds = array<i64: 1, 128>}, {pipeline_mode = #tpu.pipeline_mode<synchronous>, transform_indices = @transform_2, window_bounds = array<i64: 1, 128>}, {transform_indices = @transform_3, window_bounds = array<i64: 128, 128>}]} {
    %c0 = arith.constant 0 : index
    %c0_0 = arith.constant 0 : index
    %0 = vector.load %arg1[%c0, %c0_0] : memref<128x128xbf16, #tpu.memory_space<vmem>>, vector<128x128xbf16>
    %1 = arith.extf %0 : vector<128x128xbf16> to vector<128x128xf32>
    %c0_1 = arith.constant 0 : index
    %c0_2 = arith.constant 0 : index
    %2 = vector.load %arg2[%c0_1, %c0_2] : memref<1x128xf32, #tpu.memory_space<vmem>>, vector<1x128xf32>
    %3 = vector.broadcast %2 : vector<1x128xf32> to vector<128x128xf32>
    %4 = arith.mulf %1, %3 : vector<128x128xf32>
    %c0_3 = arith.constant 0 : index
    %c0_4 = arith.constant 0 : index
    %5 = vector.load %arg3[%c0_3, %c0_4] : memref<1x128xf32, #tpu.memory_space<vmem>>, vector<1x128xf32>
    %6 = vector.broadcast %5 : vector<1x128xf32> to vector<128x128xf32>
    %7 = arith.addf %4, %6 : vector<128x128xf32>
    %cst = arith.constant 0.000000e+00 : f32
    %8 = vector.broadcast %cst : f32 to vector<128x128xf32>
    %9 = arith.maximumf %7, %8 : vector<128x128xf32>
    %10 = arith.truncf %9 : vector<128x128xf32> to vector<128x128xbf16>
    %c0_5 = arith.constant 0 : index
    %c0_6 = arith.constant 0 : index
    %11 = vector.load %arg4[%c0_5, %c0_6] : memref<128x128xbf16, #tpu.memory_space<vmem>>, vector<128x128xbf16>
    tpu.vector_store %arg4[%c0_5, %c0_6], %10 {strides = array<i32>} : memref<128x128xbf16, #tpu.memory_space<vmem>>, vector<128x128xbf16>,
    return
  }
  func.func @transform_0(%arg0: i32) -> (i32, i32) {
    %c0_i32 = arith.constant 0 : i32
    %c0_i32_0 = arith.constant 0 : i32
    return %arg0, %c0_i32 : i32, i32
  }
  func.func @transform_1(%arg0: i32) -> (i32, i32) {
    %c0_i32 = arith.constant 0 : i32
    %c0_i32_0 = arith.constant 0 : i32
    %c0_i32_1 = arith.constant 0 : i32
    return %c0_i32, %c0_i32_0 : i32, i32
  }
  func.func @transform_2(%arg0: i32) -> (i32, i32) {
    %c0_i32 = arith.constant 0 : i32
    %c0_i32_0 = arith.constant 0 : i32
    %c0_i32_1 = arith.constant 0 : i32
    return %c0_i32, %c0_i32_0 : i32, i32
  }
  func.func @transform_3(%arg0: i32) -> (i32, i32) {
    %c0_i32 = arith.constant 0 : i32
    %c0_i32_0 = arith.constant 0 : i32
    return %arg0, %c0_i32 : i32, i32
  }
}

module attributes {stable_mosaic.version = 11 : i64} {
  func.func @_conv_matmul_stats_kernel(%arg0: i32, %arg1: i32, %arg2: i32, %arg3: memref<128x128xbf16, #tpu.memory_space<vmem>>, %arg4: memref<128x128xbf16, #tpu.memory_space<vmem>>, %arg5: memref<128x128xbf16, #tpu.memory_space<vmem>>, %arg6: memref<8x128xf32, #tpu.memory_space<vmem>>, %arg7: memref<128x128xf32, #tpu.memory_space<vmem>>) attributes {dimension_semantics = [#tpu.dimension_semantics<parallel>, #tpu.dimension_semantics<parallel>, #tpu.dimension_semantics<arbitrary>], iteration_bounds = array<i64: 1, 1, 1>, scalar_prefetch = 0 : i64, scratch_operands = 1 : i64, tpu.core_type = #tpu.core_type<tc>, window_params = [{transform_indices = @transform_0, window_bounds = array<i64: 128, 128>}, {transform_indices = @transform_1, window_bounds = array<i64: 128, 128>}, {transform_indices = @transform_2, window_bounds = array<i64: 128, 128>}, {transform_indices = @transform_3, window_bounds = array<i64: 8, 128>}]} {
    %c0_i32 = arith.constant 0 : i32
    %0 = arith.cmpi eq, %arg2, %c0_i32 : i32
    %1 = arith.extui %0 : i1 to i32
    %c0_i32_0 = arith.constant 0 : i32
    %2 = arith.cmpi ne, %1, %c0_i32_0 : i32
    scf.if %2 {
      %cst_10 = arith.constant 0.000000e+00 : f32
      %12 = vector.broadcast %cst_10 : f32 to vector<128x128xf32>
      %c0_11 = arith.constant 0 : index
      %c0_12 = arith.constant 0 : index
      %13 = vector.load %arg7[%c0_11, %c0_12] : memref<128x128xf32, #tpu.memory_space<vmem>>, vector<128x128xf32>
      tpu.vector_store %arg7[%c0_11, %c0_12], %12 {strides = array<i32>} : memref<128x128xf32, #tpu.memory_space<vmem>>, vector<128x128xf32>,
    } else {
    }
    %c0 = arith.constant 0 : index
    %c0_1 = arith.constant 0 : index
    %3 = vector.load %arg7[%c0, %c0_1] : memref<128x128xf32, #tpu.memory_space<vmem>>, vector<128x128xf32>
    %c0_2 = arith.constant 0 : index
    %c0_3 = arith.constant 0 : index
    %4 = vector.load %arg3[%c0_2, %c0_3] : memref<128x128xbf16, #tpu.memory_space<vmem>>, vector<128x128xbf16>
    %c0_4 = arith.constant 0 : index
    %c0_5 = arith.constant 0 : index
    %5 = vector.load %arg4[%c0_4, %c0_5] : memref<128x128xbf16, #tpu.memory_space<vmem>>, vector<128x128xbf16>
    %cst = arith.constant dense<0.000000e+00> : vector<128x128xf32>
    %6 = tpu.matmul %4, %5, %cst {dimension_numbers = #tpu.dot_dimension_numbers<[1], [0], [0], [1], [0, 0, 1, 1], [], []>} : vector<128x128xbf16>, vector<128x128xbf16>, vector<128x128xf32> -> vector<128x128xf32>
    %7 = arith.addf %3, %6 : vector<128x128xf32>
    %c0_6 = arith.constant 0 : index
    %c0_7 = arith.constant 0 : index
    %8 = vector.load %arg7[%c0_6, %c0_7] : memref<128x128xf32, #tpu.memory_space<vmem>>, vector<128x128xf32>
    tpu.vector_store %arg7[%c0_6, %c0_7], %7 {strides = array<i32>} : memref<128x128xf32, #tpu.memory_space<vmem>>, vector<128x128xf32>,
    %c0_i32_8 = arith.constant 0 : i32
    %9 = arith.cmpi eq, %arg2, %c0_i32_8 : i32
    %10 = arith.extui %9 : i1 to i32
    %c0_i32_9 = arith.constant 0 : i32
    %11 = arith.cmpi ne, %10, %c0_i32_9 : i32
    scf.if %11 {
      %c0_10 = arith.constant 0 : index
      %c0_11 = arith.constant 0 : index
      %12 = vector.load %arg7[%c0_10, %c0_11] : memref<128x128xf32, #tpu.memory_space<vmem>>, vector<128x128xf32>
      %13 = arith.truncf %12 : vector<128x128xf32> to vector<128x128xbf16>
      %c0_12 = arith.constant 0 : index
      %c0_13 = arith.constant 0 : index
      %14 = vector.load %arg5[%c0_12, %c0_13] : memref<128x128xbf16, #tpu.memory_space<vmem>>, vector<128x128xbf16>
      tpu.vector_store %arg5[%c0_12, %c0_13], %13 {strides = array<i32>} : memref<128x128xbf16, #tpu.memory_space<vmem>>, vector<128x128xbf16>,
      %cst_14 = arith.constant dense<0.000000e+00> : vector<128xf32>
      %15 = vector.multi_reduction <add>, %12, %cst_14 [0] : vector<128x128xf32> to vector<128xf32>
      %16 = vector.shape_cast %15 : vector<128xf32> to vector<1x128xf32>
      %17 = arith.mulf %12, %12 : vector<128x128xf32>
      %cst_15 = arith.constant dense<0.000000e+00> : vector<128xf32>
      %18 = vector.multi_reduction <add>, %17, %cst_15 [0] : vector<128x128xf32> to vector<128xf32>
      %19 = vector.shape_cast %18 : vector<128xf32> to vector<1x128xf32>
      %20 = tpu.iota {dimensions = array<i32: 0>} : vector<8x128xi32>
      %c0_i32_16 = arith.constant 0 : i32
      %21 = vector.broadcast %c0_i32_16 : i32 to vector<8x128xi32>
      %22 = arith.cmpi eq, %20, %21 : vector<8x128xi32>
      %c1_i32 = arith.constant 1 : i32
      %23 = vector.broadcast %c1_i32 : i32 to vector<8x128xi32>
      %24 = arith.cmpi eq, %20, %23 : vector<8x128xi32>
      %cst_17 = arith.constant 0.000000e+00 : f32
      %25 = vector.shape_cast %19 : vector<1x128xf32> to vector<1x128xf32>
      %26 = vector.broadcast %25 : vector<1x128xf32> to vector<8x128xf32>
      %27 = vector.broadcast %cst_17 : f32 to vector<8x128xf32>
      %28 = arith.select %24, %26, %27 : vector<8x128xi1>, vector<8x128xf32>
      %29 = vector.shape_cast %16 : vector<1x128xf32> to vector<1x128xf32>
      %30 = vector.broadcast %29 : vector<1x128xf32> to vector<8x128xf32>
      %31 = arith.select %22, %30, %28 : vector<8x128xi1>, vector<8x128xf32>
      %c0_18 = arith.constant 0 : index
      %c0_19 = arith.constant 0 : index
      %32 = vector.load %arg6[%c0_18, %c0_19] : memref<8x128xf32, #tpu.memory_space<vmem>>, vector<8x128xf32>
      tpu.vector_store %arg6[%c0_18, %c0_19], %31 {strides = array<i32>} : memref<8x128xf32, #tpu.memory_space<vmem>>, vector<8x128xf32>,
    } else {
    }
    return
  }
  func.func @transform_0(%arg0: i32, %arg1: i32, %arg2: i32) -> (i32, i32) {
    %c0_i32 = arith.constant 0 : i32
    return %arg0, %arg2 : i32, i32
  }
  func.func @transform_1(%arg0: i32, %arg1: i32, %arg2: i32) -> (i32, i32) {
    %c0_i32 = arith.constant 0 : i32
    return %arg2, %arg1 : i32, i32
  }
  func.func @transform_2(%arg0: i32, %arg1: i32, %arg2: i32) -> (i32, i32) {
    %c0_i32 = arith.constant 0 : i32
    return %arg0, %arg1 : i32, i32
  }
  func.func @transform_3(%arg0: i32, %arg1: i32, %arg2: i32) -> (i32, i32) {
    %c0_i32 = arith.constant 0 : i32
    return %arg0, %arg1 : i32, i32
  }
}

module attributes {stable_mosaic.version = 11 : i64} {
  func.func @_bn_add_relu_kernel(%arg0: i32, %arg1: memref<128x128xbf16, #tpu.memory_space<vmem>>, %arg2: memref<1x128xf32, #tpu.memory_space<vmem>>, %arg3: memref<1x128xf32, #tpu.memory_space<vmem>>, %arg4: memref<128x128xbf16, #tpu.memory_space<vmem>>, %arg5: memref<1x128xf32, #tpu.memory_space<vmem>>, %arg6: memref<1x128xf32, #tpu.memory_space<vmem>>, %arg7: memref<128x128xf32, #tpu.memory_space<vmem>>) attributes {dimension_semantics = [#tpu.dimension_semantics<parallel>], iteration_bounds = array<i64: 1>, scalar_prefetch = 0 : i64, scratch_operands = 0 : i64, tpu.core_type = #tpu.core_type<tc>, window_params = [{transform_indices = @transform_0, window_bounds = array<i64: 128, 128>}, {pipeline_mode = #tpu.pipeline_mode<synchronous>, transform_indices = @transform_1, window_bounds = array<i64: 1, 128>}, {pipeline_mode = #tpu.pipeline_mode<synchronous>, transform_indices = @transform_2, window_bounds = array<i64: 1, 128>}, {transform_indices = @transform_3, window_bounds = array<i64: 128, 128>}, {pipeline_mode = #tpu.pipeline_mode<synchronous>, transform_indices = @transform_4, window_bounds = array<i64: 1, 128>}, {pipeline_mode = #tpu.pipeline_mode<synchronous>, transform_indices = @transform_5, window_bounds = array<i64: 1, 128>}, {transform_indices = @transform_6, window_bounds = array<i64: 128, 128>}]} {
    %c0 = arith.constant 0 : index
    %c0_0 = arith.constant 0 : index
    %0 = vector.load %arg1[%c0, %c0_0] : memref<128x128xbf16, #tpu.memory_space<vmem>>, vector<128x128xbf16>
    %1 = arith.extf %0 : vector<128x128xbf16> to vector<128x128xf32>
    %c0_1 = arith.constant 0 : index
    %c0_2 = arith.constant 0 : index
    %2 = vector.load %arg2[%c0_1, %c0_2] : memref<1x128xf32, #tpu.memory_space<vmem>>, vector<1x128xf32>
    %3 = vector.broadcast %2 : vector<1x128xf32> to vector<128x128xf32>
    %4 = arith.mulf %1, %3 : vector<128x128xf32>
    %c0_3 = arith.constant 0 : index
    %c0_4 = arith.constant 0 : index
    %5 = vector.load %arg3[%c0_3, %c0_4] : memref<1x128xf32, #tpu.memory_space<vmem>>, vector<1x128xf32>
    %6 = vector.broadcast %5 : vector<1x128xf32> to vector<128x128xf32>
    %7 = arith.addf %4, %6 : vector<128x128xf32>
    %c0_5 = arith.constant 0 : index
    %c0_6 = arith.constant 0 : index
    %8 = vector.load %arg4[%c0_5, %c0_6] : memref<128x128xbf16, #tpu.memory_space<vmem>>, vector<128x128xbf16>
    %9 = arith.extf %8 : vector<128x128xbf16> to vector<128x128xf32>
    %c0_7 = arith.constant 0 : index
    %c0_8 = arith.constant 0 : index
    %10 = vector.load %arg5[%c0_7, %c0_8] : memref<1x128xf32, #tpu.memory_space<vmem>>, vector<1x128xf32>
    %11 = vector.broadcast %10 : vector<1x128xf32> to vector<128x128xf32>
    %12 = arith.mulf %9, %11 : vector<128x128xf32>
    %c0_9 = arith.constant 0 : index
    %c0_10 = arith.constant 0 : index
    %13 = vector.load %arg6[%c0_9, %c0_10] : memref<1x128xf32, #tpu.memory_space<vmem>>, vector<1x128xf32>
    %14 = vector.broadcast %13 : vector<1x128xf32> to vector<128x128xf32>
    %15 = arith.addf %12, %14 : vector<128x128xf32>
    %16 = arith.addf %7, %15 : vector<128x128xf32>
    %cst = arith.constant 0.000000e+00 : f32
    %17 = vector.broadcast %cst : f32 to vector<128x128xf32>
    %18 = arith.maximumf %16, %17 : vector<128x128xf32>
    %c0_11 = arith.constant 0 : index
    %c0_12 = arith.constant 0 : index
    %19 = vector.load %arg7[%c0_11, %c0_12] : memref<128x128xf32, #tpu.memory_space<vmem>>, vector<128x128xf32>
    tpu.vector_store %arg7[%c0_11, %c0_12], %18 {strides = array<i32>} : memref<128x128xf32, #tpu.memory_space<vmem>>, vector<128x128xf32>,
    return
  }
  func.func @transform_0(%arg0: i32) -> (i32, i32) {
    %c0_i32 = arith.constant 0 : i32
    %c0_i32_0 = arith.constant 0 : i32
    return %arg0, %c0_i32 : i32, i32
  }
  func.func @transform_1(%arg0: i32) -> (i32, i32) {
    %c0_i32 = arith.constant 0 : i32
    %c0_i32_0 = arith.constant 0 : i32
    %c0_i32_1 = arith.constant 0 : i32
    return %c0_i32, %c0_i32_0 : i32, i32
  }
  func.func @transform_2(%arg0: i32) -> (i32, i32) {
    %c0_i32 = arith.constant 0 : i32
    %c0_i32_0 = arith.constant 0 : i32
    %c0_i32_1 = arith.constant 0 : i32
    return %c0_i32, %c0_i32_0 : i32, i32
  }
  func.func @transform_3(%arg0: i32) -> (i32, i32) {
    %c0_i32 = arith.constant 0 : i32
    %c0_i32_0 = arith.constant 0 : i32
    return %arg0, %c0_i32 : i32, i32
  }
  func.func @transform_4(%arg0: i32) -> (i32, i32) {
    %c0_i32 = arith.constant 0 : i32
    %c0_i32_0 = arith.constant 0 : i32
    %c0_i32_1 = arith.constant 0 : i32
    return %c0_i32, %c0_i32_0 : i32, i32
  }
  func.func @transform_5(%arg0: i32) -> (i32, i32) {
    %c0_i32 = arith.constant 0 : i32
    %c0_i32_0 = arith.constant 0 : i32
    %c0_i32_1 = arith.constant 0 : i32
    return %c0_i32, %c0_i32_0 : i32, i32
  }
  func.func @transform_6(%arg0: i32) -> (i32, i32) {
    %c0_i32 = arith.constant 0 : i32
    %c0_i32_0 = arith.constant 0 : i32
    return %arg0, %c0_i32 : i32, i32
  }
}

</mosaic_0001>

<bundles_post_ra>
// kernel: basic_block_forward.6
= control target key start
LH: loop header
LB: loop body
LE: loop exit
PB: predicated region body
PF: predicated region fallthrough
CT: control target
= control target key end

     0   :  { %s422_s0 = inlined_call_operand.vmem [shape: bf16[128,128], index: 0, kind: input, shape index: {}]   ;;  %s423_s1 = inlined_call_operand.vmem [shape: f32[1,128], index: 1, kind: input, shape index: {}]   ;;  %s424_s2 = inlined_call_operand.vmem [shape: f32[1,128], index: 2, kind: input, shape index: {}]   ;;  %s425_s3 = inlined_call_operand.vmem [shape: bf16[128,128], index: 3, kind: output, shape index: {}]  }
   0x1   :  { %v227_v0 = vld [vmem:[%s422_s0] sm:$0xff]   ;;  %v298_v4 = vld [vmem:[%s422_s0 + $0x8] sm:$0xff]   ;;  %v299_v5 = vld [vmem:[%s422_s0 + $0x10] sm:$0xff]  }
   0x2   :  { %v338_v1 = vld [vmem:[%s423_s1] ss:$0 sm:$0xff]  ;;  %v228_v2 = vunpack.c.l.bf16 %v227_v0  ;;  %v229_v3 = vunpack.c.h.bf16 %v227_v0  ;;  %v300_v6 = vld [vmem:[%s422_s0 + $0x18] sm:$0xff]   ;;  %v232_v8 = vunpack.c.l.bf16 %v298_v4  ;;  %v233_v9 = vunpack.c.h.bf16 %v298_v4  ;;  %v302_v33 = vld [vmem:[%s422_s0 + $0x28] sm:$0xff]  }
   0x3   :  { %v352_v7 = vld [vmem:[%s424_s2] ss:$0 sm:$0xff]  ;;  %v236_v10 = vunpack.c.l.bf16 %v299_v5  ;;  %v237_v11 = vunpack.c.h.bf16 %v299_v5  ;;  %v240_v14 = vunpack.c.l.bf16 %v300_v6  ;;  %v241_v15 = vunpack.c.h.bf16 %v300_v6  ;;  %v303_v38 = vld [vmem:[%s422_s0 + $0x30] sm:$0xff]   ;;  %v304_v43 = vld [vmem:[%s422_s0 + $0x38] sm:$0xff]  }
   0x4   :  { %v53_v12 = vmul.f32 %v228_v2, %v338_v1  ;;  %v54_v13 = vmul.f32 %v229_v3, %v338_v1  ;;  %v55_v16 = vmul.f32 %v232_v8, %v338_v1  ;;  %v56_v17 = vmul.f32 %v233_v9, %v338_v1  ;;  %v301_v28 = vld [vmem:[%s422_s0 + $0x20] sm:$0xff]  }
   0x5   :  { %v57_v18 = vmul.f32 %v236_v10, %v338_v1  ;;  %v58_v19 = vmul.f32 %v237_v11, %v338_v1  ;;  %v59_v22 = vmul.f32 %v240_v14, %v338_v1  ;;  %v60_v23 = vmul.f32 %v241_v15, %v338_v1 }
   0x6   :  { %v76_v20 = vadd.f32 %v352_v7, %v53_v12  ;;  %v77_v21 = vadd.f32 %v352_v7, %v54_v13  ;;  %v78_v24 = vadd.f32 %v352_v7, %v55_v16  ;;  %v79_v25 = vadd.f32 %v352_v7, %v56_v17 }
   0x7   :  { %v80_v26 = vadd.f32 %v352_v7, %v57_v18  ;;  %v81_v27 = vadd.f32 %v352_v7, %v58_v19  ;;  %v82_v31 = vadd.f32 %v352_v7, %v59_v22  ;;  %v83_v32 = vadd.f32 %v352_v7, %v60_v23 }
   0x8   :  { %v92_v29 = vmax.f32 %v76_v20, 0.0  ;;  %v93_v30 = vmax.f32 %v77_v21, 0.0  ;;  %v94_v34 = vmax.f32 %v78_v24, 0.0  ;;  %v95_v35 = vmax.f32 %v79_v25, 0.0 }
   0x9   :  { %v96_v36 = vmax.f32 %v80_v26, 0.0  ;;  %v97_v37 = vmax.f32 %v81_v27, 0.0  ;;  %v98_v40 = vmax.f32 %v82_v31, 0.0  ;;  %v99_v41 = vmax.f32 %v83_v32, 0.0 }
   0xa   :  { %v261_v39 = vpack.c.bf16 %v93_v30, %v92_v29  ;;  %v244_v42 = vunpack.c.l.bf16 %v301_v28  ;;  %v266_v44 = vpack.c.bf16 %v95_v35, %v94_v34  ;;  %v245_v46 = vunpack.c.h.bf16 %v301_v28 }
   0xb   :  { %v271_v45 = vpack.c.bf16 %v97_v37, %v96_v36  ;;  %v248_v47 = vunpack.c.l.bf16 %v302_v33  ;;  %v276_v48 = vpack.c.bf16 %v99_v41, %v98_v40  ;;  %v249_v50 = vunpack.c.h.bf16 %v302_v33 }
   0xc   :  { %262 = vst [vmem:[%s425_s3] sm:$0xff] %v261_v39   ;;  %v61_v49 = vmul.f32 %v244_v42, %v338_v1  ;;  %v252_v51 = vunpack.c.l.bf16 %v303_v38  ;;  %305 = vst [vmem:[%s425_s3 + $0x8] sm:$0xff] %v266_v44   ;;  %v62_v52 = vmul.f32 %v245_v46, %v338_v1  ;;  %v253_v54 = vunpack.c.h.bf16 %v303_v38 }
   0xd   :  { %306 = vst [vmem:[%s425_s3 + $0x10] sm:$0xff] %v271_v45   ;;  %v63_v53 = vmul.f32 %v248_v47, %v338_v1  ;;  %v256_v55 = vunpack.c.l.bf16 %v304_v43  ;;  %307 = vst [vmem:[%s425_s3 + $0x18] sm:$0xff] %v276_v48   ;;  %v64_v57 = vmul.f32 %v249_v50, %v338_v1  ;;  %v257_v59 = vunpack.c.h.bf16 %v304_v43 }
   0xe   :  { %v84_v56 = vadd.f32 %v352_v7, %v61_v49  ;;  %v65_v58 = vmul.f32 %v252_v51, %v338_v1  ;;  %v85_v60 = vadd.f32 %v352_v7, %v62_v52  ;;  %v66_v62 = vmul.f32 %v253_v54, %v338_v1 }
   0xf   :  { %v86_v61 = vadd.f32 %v352_v7, %v63_v53  ;;  %v67_v63 = vmul.f32 %v256_v55, %v338_v1  ;;  %v87_v2 = vadd.f32 %v352_v7, %v64_v57  ;;  %v68_v4 = vmul.f32 %v257_v59, %v338_v1 }
  0x10   :  { %v100_v0 = vmax.f32 %v84_v56, 0.0  ;;  %v88_v3 = vadd.f32 %v352_v7, %v65_v58  ;;  %v101_v5 = vmax.f32 %v85_v60, 0.0  ;;  %v89_v8 = vadd.f32 %v352_v7, %v66_v62 }
  0x11   :  { %v102_v6 = vmax.f32 %v86_v61, 0.0  ;;  %v90_v9 = vadd.f32 %v352_v7, %v67_v63  ;;  %v103_v10 = vmax.f32 %v87_v2, 0.0  ;;  %v91_v12 = vadd.f32 %v352_v7, %v68_v4 }
  0x12   :  { %v104_v11 = vmax.f32 %v88_v3, 0.0  ;;  %v281_v13 = vpack.c.bf16 %v101_v5, %v100_v0  ;;  %v105_v14 = vmax.f32 %v89_v8, 0.0 }
  0x13   :  { %v106_v15 = vmax.f32 %v90_v9, 0.0  ;;  %v286_v16 = vpack.c.bf16 %v103_v10, %v102_v6  ;;  %v107_v17 = vmax.f32 %v91_v12, 0.0 }
  0x14   :  { %308 = vst [vmem:[%s425_s3 + $0x20] sm:$0xff] %v281_v13   ;;  %v291_v1 = vpack.c.bf16 %v105_v14, %v104_v11 }
  0x15   :  { %309 = vst [vmem:[%s425_s3 + $0x28] sm:$0xff] %v286_v16   ;;  %v296_v18 = vpack.c.bf16 %v107_v17, %v106_v15 }
  0x16   :  { %310 = vst [vmem:[%s425_s3 + $0x30] sm:$0xff] %v291_v1  }
  0x17   :  { %311 = vst [vmem:[%s425_s3 + $0x38] sm:$0xff] %v296_v18  }

// kernel: basic_block_forward.5
= control target key start
LH: loop header
LB: loop body
LE: loop exit
PB: predicated region body
PF: predicated region fallthrough
CT: control target
= control target key end

     0   :  { %s749_s1 = inlined_call_operand.vmem [shape: bf16[128,128], index: 1, kind: input, shape index: {}]   ;;  %s750_s0 = inlined_call_operand.vmem [shape: bf16[128,128], index: 0, kind: input, shape index: {}]   ;;  %s751_s2 = inlined_call_operand.vmem [shape: bf16[128,128], index: 2, kind: output, shape index: {0}]   ;;  %s752_s3 = inlined_call_operand.vmem [shape: f32[8,128], index: 3, kind: output, shape index: {1}]  }
   0x1   :  { %v638_v0 = vld [vmem:[%s749_s1] sm:$0xff]   ;;  %v639_v1 = vld [vmem:[%s749_s1 + $0x8] sm:$0xff]   ;;  %v640_v2 = vld [vmem:[%s749_s1 + $0x10] sm:$0xff]  }
   0x2   :  { %590 = vmatprep.subr.bf16.mxu0 %v638_v0  ;;  %622 = vmatprep.subr.bf16.mxu1 %v638_v0  ;;  %v641_v3 = vld [vmem:[%s749_s1 + $0x18] sm:$0xff]   ;;  %v646_v4 = vld [vmem:[%s750_s0] sm:$0xff]   ;;  %v643_v7 = vld [vmem:[%s749_s1 + $0x28] sm:$0xff]  }
   0x3   :  { %591 = vmatpush3.bf16.msra.mxu0 %v638_v0  ;;  %630 = vmatpush3.bf16.msra.mxu1 %v638_v0  ;;  %v642_v5 = vld [vmem:[%s749_s1 + $0x20] sm:$0xff]   ;;  %v644_v8 = vld [vmem:[%s749_s1 + $0x30] sm:$0xff]   ;;  %v645_v9 = vld [vmem:[%s749_s1 + $0x38] sm:$0xff]  }
   0x4   :  { %592 = vmatprep.subr.bf16.mxu0 %v639_v1  ;;  %623 = vmatprep.subr.bf16.mxu1 %v639_v1  ;;  %v650_v6 = vld [vmem:[%s750_s0 + $0x20] sm:$0xff]   ;;  %v647_v10 = vld [vmem:[%s750_s0 + $0x8] sm:$0xff]   ;;  %v648_v12 = vld [vmem:[%s750_s0 + $0x10] sm:$0xff]  }
   0x5   :  { %606 = vmatprep.mubr.bf16.mxu0 %v646_v4  ;;  %614 = vmatprep.mubr.bf16.mxu1 %v650_v6  ;;  %v651_v11 = vld [vmem:[%s750_s0 + $0x28] sm:$0xff]   ;;  %v652_v13 = vld [vmem:[%s750_s0 + $0x30] sm:$0xff]   ;;  %v649_v14 = vld [vmem:[%s750_s0 + $0x18] sm:$0xff]  }
   0x6   :  { %v653_v15 = vld [vmem:[%s750_s0 + $0x38] sm:$0xff]  }
   0x7   :  { %593 = vmatpush3.bf16.msra.mxu0 %v639_v1  ;;  %631 = vmatpush3.bf16.msra.mxu1 %v639_v1 }
   0x8   :  { %594 = vmatprep.subr.bf16.mxu0 %v640_v2  ;;  %624 = vmatprep.subr.bf16.mxu1 %v640_v2 }
   0xb   :  { %595 = vmatpush3.bf16.msra.mxu0 %v640_v2  ;;  %632 = vmatpush3.bf16.msra.mxu1 %v640_v2 }
   0xc   :  { %596 = vmatprep.subr.bf16.mxu0 %v641_v3  ;;  %625 = vmatprep.subr.bf16.mxu1 %v641_v3 }
   0xf   :  { %597 = vmatpush3.bf16.msra.mxu0 %v641_v3  ;;  %633 = vmatpush3.bf16.msra.mxu1 %v641_v3 }
  0x10   :  { %598 = vmatprep.subr.bf16.mxu0 %v642_v5  ;;  %626 = vmatprep.subr.bf16.mxu1 %v642_v5 }
  0x13   :  { %599 = vmatpush3.bf16.msra.mxu0 %v642_v5  ;;  %634 = vmatpush3.bf16.msra.mxu1 %v642_v5 }
  0x14   :  { %600 = vmatprep.subr.bf16.mxu0 %v643_v7  ;;  %627 = vmatprep.subr.bf16.mxu1 %v643_v7 }
  0x17   :  { %601 = vmatpush3.bf16.msra.mxu0 %v643_v7  ;;  %635 = vmatpush3.bf16.msra.mxu1 %v643_v7 }
  0x18   :  { %602 = vmatprep.subr.bf16.mxu0 %v644_v8  ;;  %628 = vmatprep.subr.bf16.mxu1 %v644_v8 }
  0x1b   :  { %603 = vmatpush3.bf16.msra.mxu0 %v644_v8  ;;  %636 = vmatpush3.bf16.msra.mxu1 %v644_v8 }
  0x1c   :  { %604 = vmatprep.subr.bf16.mxu0 %v645_v9  ;;  %629 = vmatprep.subr.bf16.mxu1 %v645_v9 }
  0x1f   :  { %605 = vmatpush3.bf16.msra.mxu0 %v645_v9  ;;  %637 = vmatpush3.bf16.msra.mxu1 %v645_v9 }
  0x22   :  { %607 = vmatmul.mubr.bf16.vlgmr.msra.gmra.mrb[0].mxu0 %v647_v10  ;;  %615 = vmatmul.mubr.bf16.vlgmr.msra.gmra.mrb[0].mxu1 %v651_v11 }
  0x23   :  { %610 = vmatprep.mubr.bf16.mxu0 %v648_v12  ;;  %618 = vmatprep.mubr.bf16.mxu1 %v652_v13 }
  0x2a   :  { %611 = vmatmul.mubr.bf16.gmra.mrb[4].mxu0 %v649_v14  ;;  %619 = vmatmul.mubr.bf16.gmra.mrb[4].mxu1 %v653_v15 }
  0xf5   :  { %v608_v16 = vpop.f32.mrb[0].mxu0  ;;  %v616_v17 = vpop.f32.mrb[0].mxu1 }
  0xf6   :  { %v212_v18 = vpop.f32.mrb[1].mxu0  ;;  %v244_v19 = vpop.f32.mrb[1].mxu1  ;;  %v429_v31 = vmul.f32 %v608_v16, %v608_v16  ;;  %v437_v3 = vmul.f32 %v616_v17, %v616_v17 }
  0xf7   :  { %v609_v20 = vpop.f32.mrb[2].mxu0  ;;  %v617_v21 = vpop.f32.mrb[2].mxu1  ;;  %v427_v22 = vmul.f32 %v212_v18, %v212_v18  ;;  %v435_v61 = vmul.f32 %v244_v19, %v244_v19 }
  0xf8   :  { %v535_v23 = vpack.c.bf16 %v609_v20, %v608_v16  ;;  %v215_v24 = vpop.f32.mrb[3].mxu0  ;;  %v555_v25 = vpack.c.bf16 %v617_v21, %v616_v17  ;;  %v247_v26 = vpop.f32.mrb[3].mxu1  ;;  %v430_v34 = vmul.f32 %v609_v20, %v609_v20  ;;  %v438_v6 = vmul.f32 %v617_v21, %v617_v21 }
  0xf9   :  { %v530_v27 = vpack.c.bf16 %v215_v24, %v212_v18  ;;  %v406_v28 = vadd.f32 %v215_v24, %v212_v18  ;;  %v428_v29 = vmul.f32 %v215_v24, %v215_v24  ;;  %v550_v30 = vpack.c.bf16 %v247_v26, %v244_v19 }
  0xfa   :  { %567 = vst [vmem:[%s751_s2 + $0x8] sm:$0xff] %v535_v23   ;;  %571 = vst [vmem:[%s751_s2 + $0x28] sm:$0xff] %v555_v25   ;;  %v436_v2 = vmul.f32 %v247_v26, %v247_v26 }
  0xfb   :  { %531 = vst [vmem:[%s751_s2] sm:$0xff] %v530_v27   ;;  %v407_v32 = vadd.f32 %v608_v16, %v406_v28  ;;  %v443_v33 = vadd.f32 %v428_v29, %v427_v22  ;;  %570 = vst [vmem:[%s751_s2 + $0x20] sm:$0xff] %v550_v30  }
  0xfd   :  { %v444_v35 = vadd.f32 %v443_v33, %v429_v31  ;;  %v612_v36 = vpop.f32.mrb[4].mxu0  ;;  %v408_v37 = vadd.f32 %v609_v20, %v407_v32  ;;  %v620_v38 = vpop.f32.mrb[4].mxu1 }
  0xfe   :  { %v228_v39 = vpop.f32.mrb[5].mxu0  ;;  %v260_v40 = vpop.f32.mrb[5].mxu1  ;;  %v433_v55 = vmul.f32 %v612_v36, %v612_v36  ;;  %v441_v15 = vmul.f32 %v620_v38, %v620_v38 }
  0xff   :  { %v409_v41 = vadd.f32 %v408_v37, %v228_v39  ;;  %v431_v42 = vmul.f32 %v228_v39, %v228_v39  ;;  %v445_v43 = vadd.f32 %v444_v35, %v430_v34  ;;  %v613_v44 = vpop.f32.mrb[6].mxu0  ;;  %v621_v45 = vpop.f32.mrb[6].mxu1  ;;  %v439_v9 = vmul.f32 %v260_v40, %v260_v40 }
 0x100   :  { %v545_v46 = vpack.c.bf16 %v613_v44, %v612_v36  ;;  %v231_v47 = vpop.f32.mrb[7].mxu0  ;;  %v565_v48 = vpack.c.bf16 %v621_v45, %v620_v38  ;;  %v263_v49 = vpop.f32.mrb[7].mxu1  ;;  %v434_v58 = vmul.f32 %v613_v44, %v613_v44 }
 0x101   :  { %v446_v50 = vadd.f32 %v445_v43, %v431_v42  ;;  %v540_v51 = vpack.c.bf16 %v231_v47, %v228_v39  ;;  %v410_v52 = vadd.f32 %v409_v41, %v231_v47  ;;  %v432_v53 = vmul.f32 %v231_v47, %v231_v47 }
 0x102   :  { %569 = vst [vmem:[%s751_s2 + $0x18] sm:$0xff] %v545_v46   ;;  %573 = vst [vmem:[%s751_s2 + $0x38] sm:$0xff] %v565_v48   ;;  %v560_v54 = vpack.c.bf16 %v263_v49, %v260_v40  ;;  %v440_v14 = vmul.f32 %v263_v49, %v263_v49 }
 0x103   :  { %568 = vst [vmem:[%s751_s2 + $0x10] sm:$0xff] %v540_v51   ;;  %v411_v56 = vadd.f32 %v612_v36, %v410_v52  ;;  %v447_v57 = vadd.f32 %v446_v50, %v432_v53 }
 0x104   :  { %572 = vst [vmem:[%s751_s2 + $0x30] sm:$0xff] %v560_v54  }
 0x105   :  { %v448_v59 = vadd.f32 %v447_v57, %v433_v55  ;;  %v412_v60 = vadd.f32 %v613_v44, %v411_v56 }
 0x107   :  { %v413_v62 = vadd.f32 %v412_v60, %v244_v19  ;;  %v449_v63 = vadd.f32 %v448_v59, %v434_v58  ;;  %v442_v19 = vmul.f32 %v621_v45, %v621_v45 }
 0x109   :  { %v450_v0 = vadd.f32 %v449_v63, %v435_v61  ;;  %v414_v1 = vadd.f32 %v413_v62, %v247_v26  ;;  %v464_v26 = vlaneseq }
 0x10b   :  { %v415_v4 = vadd.f32 %v616_v17, %v414_v1  ;;  %v451_v5 = vadd.f32 %v450_v0, %v436_v2  ;;  %v465_v30 = vshrl.u32 %v464_v26, 7 }
 0x10d   :  { %v452_v7 = vadd.f32 %v451_v5, %v437_v3  ;;  %v416_v8 = vadd.f32 %v617_v21, %v415_v4  ;;  %vm467_vm0 = vcmp.eq.s32.totalorder %v465_v30, 1  ;;  %vm466_vm1 = vcmp.eq.s32.totalorder %v465_v30, 0 }
 0x10f   :  { %v417_v10 = vadd.f32 %v416_v8, %v260_v40  ;;  %v453_v11 = vadd.f32 %v452_v7, %v438_v6 }
 0x111   :  { %v454_v12 = vadd.f32 %v453_v11, %v439_v9  ;;  %v418_v13 = vadd.f32 %v417_v10, %v263_v49 }
 0x113   :  { %v419_v16 = vadd.f32 %v620_v38, %v418_v13  ;;  %v455_v18 = vadd.f32 %v454_v12, %v440_v14 }
 0x115   :  { %v420_v20 = vadd.f32 %v621_v45, %v419_v16  ;;  %v456_v22 = vadd.f32 %v455_v18, %v441_v15 }
 0x117   :  { %v421_v23 = vrot.slane %v420_v20, 4  ;;  %v457_v24 = vadd.f32 %v456_v22, %v442_v19 }
 0x119   :  { %v422_v25 = vadd.f32 %v421_v23, %v420_v20  ;;  %v458_v17 = vrot.slane %v457_v24, 4 }
 0x11b   :  { %v423_v27 = vrot.slane %v422_v25, 2  ;;  %v459_v28 = vadd.f32 %v458_v17, %v457_v24 }
 0x11d   :  { %v424_v21 = vadd.f32 %v423_v27, %v422_v25  ;;  %v460_v29 = vrot.slane %v459_v28, 2 }
 0x11f   :  { %v461_v31 = vadd.f32 %v460_v29, %v459_v28  ;;  %v425_v32 = vrot.slane %v424_v21, 1 }
 0x121   :  { %v462_v33 = vrot.slane %v461_v31, 1  ;;  %v426_v35 = vadd.f32 %v425_v32, %v424_v21 }
 0x123   :  { %v463_v34 = vadd.f32 %v462_v33, %v461_v31 }
 0x125   :  { %v468_v36 = vsel %vm467_vm0, %v463_v34, 0.0 }
 0x126   :  { %v469_v37 = vsel %vm466_vm1, %v426_v35, %v468_v36 }
 0x127   :  { %470 = vst [vmem:[%s752_s3] sm:$0xff] %v469_v37 }

// kernel: basic_block_forward.9
= control target key start
LH: loop header
LB: loop body
LE: loop exit
PB: predicated region body
PF: predicated region fallthrough
CT: control target
= control target key end

     0   :  { %s528_s0 = inlined_call_operand.vmem [shape: bf16[128,128], index: 0, kind: input, shape index: {}]   ;;  %s529_s1 = inlined_call_operand.vmem [shape: f32[1,128], index: 1, kind: input, shape index: {}]   ;;  %s530_s2 = inlined_call_operand.vmem [shape: f32[1,128], index: 2, kind: input, shape index: {}]   ;;  %s531_s3 = inlined_call_operand.vmem [shape: bf16[128,128], index: 3, kind: input, shape index: {}]   ;;  %s532_s4 = inlined_call_operand.vmem [shape: f32[1,128], index: 4, kind: input, shape index: {}]   ;;  %s533_s5 = inlined_call_operand.vmem [shape: f32[1,128], index: 5, kind: input, shape index: {}]   ;;  %s534_s6 = inlined_call_operand.vmem [shape: f32[128,128], index: 6, kind: output, shape index: {}]  }
   0x1   :  { %v236_v0 = vld [vmem:[%s528_s0] sm:$0xff]   ;;  %v299_v9 = vld [vmem:[%s528_s0 + $0x8] sm:$0xff]   ;;  %v300_v20 = vld [vmem:[%s528_s0 + $0x10] sm:$0xff]  }
   0x2   :  { %v354_v1 = vld [vmem:[%s529_s1] ss:$0 sm:$0xff]  ;;  %v237_v2 = vunpack.c.l.bf16 %v236_v0  ;;  %v238_v5 = vunpack.c.h.bf16 %v236_v0  ;;  %v306_v10 = vld [vmem:[%s531_s3 + $0x8] sm:$0xff]   ;;  %v241_v14 = vunpack.c.l.bf16 %v299_v9  ;;  %v242_v18 = vunpack.c.h.bf16 %v299_v9  ;;  %v307_v21 = vld [vmem:[%s531_s3 + $0x10] sm:$0xff]  }
   0x3   :  { %v268_v3 = vld [vmem:[%s531_s3] sm:$0xff]   ;;  %v273_v15 = vunpack.c.l.bf16 %v306_v10  ;;  %v274_v19 = vunpack.c.h.bf16 %v306_v10  ;;  %v245_v32 = vunpack.c.l.bf16 %v300_v20  ;;  %v277_v33 = vunpack.c.l.bf16 %v307_v21  ;;  %v301_v42 = vld [vmem:[%s528_s0 + $0x18] sm:$0xff]  }
   0x4   :  { %v362_v4 = vld [vmem:[%s532_s4] ss:$0 sm:$0xff]  ;;  %v269_v7 = vunpack.c.l.bf16 %v268_v3  ;;  %v270_v8 = vunpack.c.h.bf16 %v268_v3  ;;  %v62_v11 = vmul.f32 %v237_v2, %v354_v1  ;;  %v63_v13 = vmul.f32 %v238_v5, %v354_v1  ;;  %v308_v43 = vld [vmem:[%s531_s3 + $0x18] sm:$0xff]  }
   0x5   :  { %v367_v6 = vld [vmem:[%s530_s2] ss:$0 sm:$0xff]  ;;  %v64_v24 = vmul.f32 %v241_v14, %v354_v1  ;;  %v142_v25 = vmul.f32 %v273_v15, %v362_v4  ;;  %v65_v28 = vmul.f32 %v242_v18, %v354_v1  ;;  %v143_v29 = vmul.f32 %v274_v19, %v362_v4  ;;  %v303_v14 = vld [vmem:[%s528_s0 + $0x28] sm:$0xff]  }
   0x6   :  { %v379_v12 = vld [vmem:[%s533_s5] ss:$0 sm:$0xff]  ;;  %v140_v16 = vmul.f32 %v269_v7, %v362_v4  ;;  %v141_v17 = vmul.f32 %v270_v8, %v362_v4  ;;  %v85_v22 = vadd.f32 %v367_v6, %v62_v11  ;;  %v86_v23 = vadd.f32 %v367_v6, %v63_v13  ;;  %v310_v19 = vld [vmem:[%s531_s3 + $0x28] sm:$0xff]  }
   0x7   :  { %v87_v30 = vadd.f32 %v367_v6, %v64_v24  ;;  %v165_v31 = vadd.f32 %v379_v12, %v142_v25  ;;  %v88_v36 = vadd.f32 %v367_v6, %v65_v28  ;;  %v166_v37 = vadd.f32 %v379_v12, %v143_v29  ;;  %v302_v52 = vld [vmem:[%s528_s0 + $0x20] sm:$0xff]  }
   0x8   :  { %v163_v26 = vadd.f32 %v379_v12, %v140_v16  ;;  %v164_v27 = vadd.f32 %v379_v12, %v141_v17  ;;  %v66_v39 = vmul.f32 %v245_v32, %v354_v1  ;;  %v144_v40 = vmul.f32 %v277_v33, %v362_v4  ;;  %v309_v57 = vld [vmem:[%s531_s3 + $0x20] sm:$0xff]   ;;  %v304_v32 = vld [vmem:[%s528_s0 + $0x30] sm:$0xff]  }
   0x9   :  { %v181_v38 = vadd.f32 %v165_v31, %v87_v30  ;;  %v246_v41 = vunpack.c.h.bf16 %v300_v20  ;;  %v182_v46 = vadd.f32 %v166_v37, %v88_v36  ;;  %v278_v47 = vunpack.c.h.bf16 %v307_v21  ;;  %v311_v33 = vld [vmem:[%s531_s3 + $0x30] sm:$0xff]  }
   0xa   :  { %v179_v34 = vadd.f32 %v163_v26, %v85_v22  ;;  %v180_v35 = vadd.f32 %v164_v27, %v86_v23  ;;  %v89_v49 = vadd.f32 %v367_v6, %v66_v39  ;;  %v167_v50 = vadd.f32 %v379_v12, %v144_v40 }
   0xb   :  { %v197_v48 = vmax.f32 %v181_v38, 0.0  ;;  %v67_v51 = vmul.f32 %v246_v41, %v354_v1  ;;  %v198_v53 = vmax.f32 %v182_v46, 0.0  ;;  %v145_v54 = vmul.f32 %v278_v47, %v362_v4  ;;  %v305_v46 = vld [vmem:[%s528_s0 + $0x38] sm:$0xff]  }
   0xc   :  { %v195_v44 = vmax.f32 %v179_v34, 0.0  ;;  %v196_v45 = vmax.f32 %v180_v35, 0.0  ;;  %v249_v55 = vunpack.c.l.bf16 %v301_v42  ;;  %v281_v56 = vunpack.c.l.bf16 %v308_v43 }
   0xd   :  { %213 = vst [vmem:[%s534_s6 + $0x10] sm:$0xff] %v197_v48  ;;  %v183_v58 = vadd.f32 %v167_v50, %v89_v49  ;;  %v90_v59 = vadd.f32 %v367_v6, %v67_v51  ;;  %v250_v60 = vunpack.c.h.bf16 %v301_v42  ;;  %v282_v61 = vunpack.c.h.bf16 %v308_v43  ;;  %214 = vst [vmem:[%s534_s6 + $0x18] sm:$0xff] %v198_v53 }
   0xe   :  { %211 = vst [vmem:[%s534_s6] sm:$0xff] %v195_v44  ;;  %212 = vst [vmem:[%s534_s6 + $0x8] sm:$0xff] %v196_v45  ;;  %v168_v62 = vadd.f32 %v379_v12, %v145_v54  ;;  %v68_v63 = vmul.f32 %v249_v55, %v354_v1  ;;  %v146_v0 = vmul.f32 %v281_v56, %v362_v4  ;;  %v253_v2 = vunpack.c.l.bf16 %v302_v52  ;;  %v312_v55 = vld [vmem:[%s531_s3 + $0x38] sm:$0xff]  }
   0xf   :  { %v199_v3 = vmax.f32 %v183_v58, 0.0  ;;  %v69_v5 = vmul.f32 %v250_v60, %v354_v1  ;;  %v147_v7 = vmul.f32 %v282_v61, %v362_v4  ;;  %v285_v8 = vunpack.c.l.bf16 %v309_v57 }
  0x10   :  { %v184_v9 = vadd.f32 %v168_v62, %v90_v59  ;;  %v91_v10 = vadd.f32 %v367_v6, %v68_v63  ;;  %v169_v11 = vadd.f32 %v379_v12, %v146_v0  ;;  %v70_v13 = vmul.f32 %v253_v2, %v354_v1 }
  0x11   :  { %215 = vst [vmem:[%s534_s6 + $0x20] sm:$0xff] %v199_v3  ;;  %v92_v15 = vadd.f32 %v367_v6, %v69_v5  ;;  %v170_v16 = vadd.f32 %v379_v12, %v147_v7  ;;  %v148_v17 = vmul.f32 %v285_v8, %v362_v4  ;;  %v254_v18 = vunpack.c.h.bf16 %v302_v52 }
  0x12   :  { %v200_v20 = vmax.f32 %v184_v9, 0.0  ;;  %v185_v21 = vadd.f32 %v169_v11, %v91_v10  ;;  %v93_v22 = vadd.f32 %v367_v6, %v70_v13  ;;  %v286_v23 = vunpack.c.h.bf16 %v309_v57 }
  0x13   :  { %v186_v24 = vadd.f32 %v170_v16, %v92_v15  ;;  %v171_v25 = vadd.f32 %v379_v12, %v148_v17  ;;  %v71_v26 = vmul.f32 %v254_v18, %v354_v1  ;;  %v257_v27 = vunpack.c.l.bf16 %v303_v14 }
  0x14   :  { %216 = vst [vmem:[%s534_s6 + $0x28] sm:$0xff] %v200_v20  ;;  %v201_v28 = vmax.f32 %v185_v21, 0.0  ;;  %v149_v29 = vmul.f32 %v286_v23, %v362_v4  ;;  %v289_v30 = vunpack.c.l.bf16 %v310_v19  ;;  %v258_v31 = vunpack.c.h.bf16 %v303_v14 }
  0x15   :  { %v202_v34 = vmax.f32 %v186_v24, 0.0  ;;  %v187_v35 = vadd.f32 %v171_v25, %v93_v22  ;;  %v94_v36 = vadd.f32 %v367_v6, %v71_v26  ;;  %v72_v37 = vmul.f32 %v257_v27, %v354_v1 }
  0x16   :  { %217 = vst [vmem:[%s534_s6 + $0x30] sm:$0xff] %v201_v28  ;;  %v172_v38 = vadd.f32 %v379_v12, %v149_v29  ;;  %v150_v39 = vmul.f32 %v289_v30, %v362_v4  ;;  %v73_v40 = vmul.f32 %v258_v31, %v354_v1  ;;  %v290_v41 = vunpack.c.h.bf16 %v310_v19 }
  0x17   :  { %218 = vst [vmem:[%s534_s6 + $0x38] sm:$0xff] %v202_v34  ;;  %v203_v42 = vmax.f32 %v187_v35, 0.0  ;;  %v95_v43 = vadd.f32 %v367_v6, %v72_v37  ;;  %v261_v44 = vunpack.c.l.bf16 %v304_v32  ;;  %v293_v45 = vunpack.c.l.bf16 %v311_v33 }
  0x18   :  { %v188_v47 = vadd.f32 %v172_v38, %v94_v36  ;;  %v173_v48 = vadd.f32 %v379_v12, %v150_v39  ;;  %v96_v49 = vadd.f32 %v367_v6, %v73_v40  ;;  %v151_v50 = vmul.f32 %v290_v41, %v362_v4 }
  0x19   :  { %219 = vst [vmem:[%s534_s6 + $0x40] sm:$0xff] %v203_v42  ;;  %v74_v51 = vmul.f32 %v261_v44, %v354_v1  ;;  %v152_v52 = vmul.f32 %v293_v45, %v362_v4  ;;  %v262_v53 = vunpack.c.h.bf16 %v304_v32  ;;  %v294_v54 = vunpack.c.h.bf16 %v311_v33 }
  0x1a   :  { %v204_v56 = vmax.f32 %v188_v47, 0.0  ;;  %v189_v57 = vadd.f32 %v173_v48, %v95_v43  ;;  %v174_v58 = vadd.f32 %v379_v12, %v151_v50  ;;  %v265_v59 = vunpack.c.l.bf16 %v305_v46 }
  0x1b   :  { %v97_v60 = vadd.f32 %v367_v6, %v74_v51  ;;  %v175_v61 = vadd.f32 %v379_v12, %v152_v52  ;;  %v75_v62 = vmul.f32 %v262_v53, %v354_v1  ;;  %v153_v63 = vmul.f32 %v294_v54, %v362_v4 }
  0x1c   :  { %220 = vst [vmem:[%s534_s6 + $0x48] sm:$0xff] %v204_v56  ;;  %v205_v0 = vmax.f32 %v189_v57, 0.0  ;;  %v190_v2 = vadd.f32 %v174_v58, %v96_v49  ;;  %v76_v3 = vmul.f32 %v265_v59, %v354_v1  ;;  %v297_v5 = vunpack.c.l.bf16 %v312_v55 }
  0x1d   :  { %v191_v7 = vadd.f32 %v175_v61, %v97_v60  ;;  %v98_v8 = vadd.f32 %v367_v6, %v75_v62  ;;  %v176_v9 = vadd.f32 %v379_v12, %v153_v63  ;;  %v266_v10 = vunpack.c.h.bf16 %v305_v46 }
  0x1e   :  { %221 = vst [vmem:[%s534_s6 + $0x50] sm:$0xff] %v205_v0  ;;  %v206_v11 = vmax.f32 %v190_v2, 0.0  ;;  %v99_v13 = vadd.f32 %v367_v6, %v76_v3  ;;  %v154_v14 = vmul.f32 %v297_v5, %v362_v4  ;;  %v298_v15 = vunpack.c.h.bf16 %v312_v55 }
  0x1f   :  { %v207_v16 = vmax.f32 %v191_v7, 0.0  ;;  %v192_v17 = vadd.f32 %v176_v9, %v98_v8  ;;  %v77_v18 = vmul.f32 %v266_v10, %v354_v1 }
  0x20   :  { %222 = vst [vmem:[%s534_s6 + $0x58] sm:$0xff] %v206_v11  ;;  %v177_v19 = vadd.f32 %v379_v12, %v154_v14  ;;  %v155_v20 = vmul.f32 %v298_v15, %v362_v4 }
  0x21   :  { %223 = vst [vmem:[%s534_s6 + $0x60] sm:$0xff] %v207_v16  ;;  %v208_v21 = vmax.f32 %v192_v17, 0.0  ;;  %v100_v22 = vadd.f32 %v367_v6, %v77_v18 }
  0x22   :  { %v193_v23 = vadd.f32 %v177_v19, %v99_v13  ;;  %v178_v24 = vadd.f32 %v379_v12, %v155_v20 }
  0x23   :  { %224 = vst [vmem:[%s534_s6 + $0x68] sm:$0xff] %v208_v21 }
  0x24   :  { %v209_v1 = vmax.f32 %v193_v23, 0.0  ;;  %v194_v25 = vadd.f32 %v178_v24, %v100_v22 }
  0x26   :  { %225 = vst [vmem:[%s534_s6 + $0x70] sm:$0xff] %v209_v1  ;;  %v210_v4 = vmax.f32 %v194_v25, 0.0 }
  0x28   :  { %226 = vst [vmem:[%s534_s6 + $0x78] sm:$0xff] %v210_v4 }

</bundles_post_ra>
